<compile_context>
chip_gen: v5e
topology: v5e:2x2
jax: 0.10.0
libtpu: 0.0.40
codegen_flags: <defaults>
</compile_context>

<pallas_src>
import functools

import jax
import jax.numpy as jnp
from jax.experimental import pallas as pl
from jax.experimental.pallas import tpu as pltpu


def _round_up(n, m):
    return ((n + m - 1) // m) * m


def _cdiv(a, b):
    return (a + b - 1) // b


def _dqn_kernel(x_ref, wp_ref, bp_ref, o_ref):
    """Fused 4-layer MLP forward on one batch tile.

    wp_ref stacks the four weight matrices along rows, zero-padded to a common
    lane width W (multiple of 128):
        rows [0, d_in)           : W1  (d_in x W)
        rows [d_in, d_in+W)      : W2  (W x W)
        rows [d_in+W, d_in+2W)   : W3  (W x W)
        rows [d_in+2W, d_in+3W)  : W4  (W x W)
    bp_ref is (4, W) float32, one bias row per layer (zero-padded).
    Zero padding keeps the padded hidden lanes exactly 0 through bias+ReLU,
    so lanes [0, output_size) of the result equal the unpadded MLP.
    """
    d_in = x_ref.shape[1]
    width = wp_ref.shape[1]
    cd = wp_ref.dtype              # bf16 (or f32) MXU feed dtype

    biases = bp_ref[...]           # (4, W) f32 — one small load
    x = x_ref[...].astype(cd)      # only cast of x (stays f32 in HBM)

    o1 = d_in
    o2 = o1 + width
    o3 = o2 + width

    # Layer 1: Linear + ReLU   (Dropout(0.2) is identity in eval mode)
    h = jnp.dot(x, wp_ref[0:o1, :], preferred_element_type=jnp.float32)
    h = jnp.maximum(h + biases[0:1, :], 0.0)          # bias/ReLU on f32 acc

    # Layer 2: Linear + ReLU   (Dropout(0.2) is identity in eval mode)
    h = jnp.dot(h.astype(cd), wp_ref[o1:o2, :],
                preferred_element_type=jnp.float32)
    h = jnp.maximum(h + biases[1:2, :], 0.0)

    # Layer 3: Linear + ReLU
    h = jnp.dot(h.astype(cd), wp_ref[o2:o3, :],
                preferred_element_type=jnp.float32)
    h = jnp.maximum(h + biases[2:3, :], 0.0)

    # Layer 4: Linear head. Lane-padded (bt, W) store -> fully dense vst;
    # real Q-values live in lanes [0, output_size).
    o_ref[...] = (jnp.dot(h.astype(cd), wp_ref[o3:o3 + width, :],
                          preferred_element_type=jnp.float32)
                  + biases[3:4, :]).astype(o_ref.dtype)

    # TODO(synk): training-mode Dropout(0.2) (pltpu.prng_random_bits mask +
    # 1/(1-p) scale) not implemented; forward matches eval-mode semantics.


def init_dqn_params(key, input_size, hidden_size=32, output_size=5):
    """PyTorch-style init: U(-1/sqrt(fan_in), 1/sqrt(fan_in)).

    Weights returned as (in_features, out_features) — transpose of PyTorch's
    (out, in) storage — so the kernel computes x @ W directly.
    """
    dims = [(input_size, hidden_size),
            (hidden_size, hidden_size),
            (hidden_size, hidden_size // 2),
            (hidden_size // 2, output_size)]
    params = {}
    for idx, (fan_in, fan_out) in enumerate(dims, start=1):
        key, kw, kb = jax.random.split(key, 3)
        bound = 1.0 / jnp.sqrt(jnp.float32(fan_in))
        params[f"w{idx}"] = jax.random.uniform(
            kw, (fan_in, fan_out), jnp.float32, minval=-bound, maxval=bound)
        params[f"b{idx}"] = jax.random.uniform(
            kb, (1, fan_out), jnp.float32, minval=-bound, maxval=bound)
    return params


def pack_dqn_params(params, *, use_bf16=True):
    """Pack w1..w4 into one bf16 slab and b1..b4 into one f32 slab (done once)."""
    w1, w2, w3, w4 = params["w1"], params["w2"], params["w3"], params["w4"]
    b1, b2, b3, b4 = params["b1"], params["b2"], params["b3"], params["b4"]
    d_in = w1.shape[0]
    out_size = w4.shape[1]
    width = max(_round_up(w.shape[1], 128) for w in (w1, w2, w3, w4))
    cd = jnp.bfloat16 if use_bf16 else jnp.float32

    def pad_to(a, rows, cols):
        r, c = a.shape
        return jnp.pad(a, ((0, rows - r), (0, cols - c)))

    wp = jnp.concatenate([
        pad_to(w1, d_in, width),
        pad_to(w2, width, width),
        pad_to(w3, width, width),
        pad_to(w4, width, width),
    ], axis=0).astype(cd)

    bp = jnp.concatenate([
        pad_to(b1, 1, width),
        pad_to(b2, 1, width),
        pad_to(b3, 1, width),
        pad_to(b4, 1, width),
    ], axis=0).astype(jnp.float32)       # biases stay f32 (added on f32 acc)

    return {"wp": wp, "bp": bp, "out_size": out_size}


def _choose_batch_tile(batch, batch_tile):
    batch_tile = max(8, _round_up(batch_tile, 8))
    if batch <= batch_tile:
        if batch > 1024:
            # v7x megacore: make >= 2 'parallel' grid steps so both TCs work.
            return _round_up(_cdiv(batch, 2), 8)
        return batch              # one full-dim tile: grid=(1,), no padding
    return batch_tile


@functools.partial(jax.jit, static_argnames=("out_size", "batch_tile"))
def _dqn_forward_impl(x, wp, bp, *, out_size, batch_tile=4096):
    batch, d_in = x.shape
    width = wp.shape[1]
    bt = _choose_batch_tile(batch, batch_tile)
    num_tiles = _cdiv(batch, bt)

    grid_spec = pltpu.PrefetchScalarGridSpec(
        num_scalar_prefetch=0,
        grid=(num_tiles,),
        in_specs=[
            # x tiled over batch only; f32 in HBM, cast inside the kernel.
            pl.BlockSpec((bt, d_in), lambda i: (i, 0)),
            # Packed params: constant index_map => fetched once (one DMA each).
            # (pipeline_mode=pl.Buffered(1) could drop the dead second buffer,
            #  but the VMEM saving is a few KB — not worth the knob.)
            pl.BlockSpec(wp.shape, lambda i: (0, 0)),
            pl.BlockSpec(bp.shape, lambda i: (0, 0)),
        ],
        out_specs=pl.BlockSpec((bt, width), lambda i: (i, 0)),
    )

    flops = 2 * batch * (d_in * width + 3 * width * width)
    bytes_accessed = (x.size * x.dtype.itemsize
                      + wp.size * wp.dtype.itemsize
                      + bp.size * bp.dtype.itemsize
                      + batch * width * 4)

    out = pl.pallas_call(
        _dqn_kernel,
        grid_spec=grid_spec,
        out_shape=jax.ShapeDtypeStruct((batch, width), jnp.float32),
        compiler_params=pltpu.CompilerParams(
            dimension_semantics=("parallel",)),
        cost_estimate=pl.CostEstimate(flops=flops, transcendentals=0,
                                      bytes_accessed=bytes_accessed),
    )(x, wp, bp)
    return out[:, :out_size]                 # drop the lane padding (in-jit)


def dqn_forward(x, packed, *, batch_tile=4096):
    """x: (B, input_size) float32 (any B). packed: output of pack_dqn_params."""
    return _dqn_forward_impl(x, packed["wp"], packed["bp"],
                             out_size=packed["out_size"],
                             batch_tile=batch_tile)


def dqn_reference(x, params, *, use_bf16=True):
    """Plain-JAX reference with the same bf16-feed / f32-accumulate numerics."""
    cd = jnp.bfloat16 if use_bf16 else jnp.float32
    h = x.astype(cd)
    for i in (1, 2, 3):
        h = jnp.dot(h, params[f"w{i}"].astype(cd),
                    preferred_element_type=jnp.float32) + params[f"b{i}"]
        h = jnp.maximum(h, 0.0).astype(cd)
    return (jnp.dot(h, params["w4"].astype(cd),
                    preferred_element_type=jnp.float32) + params["b4"])


if __name__ == "__main__":
    key = jax.random.PRNGKey(0)
    k_param, k_x, k_big = jax.random.split(key, 3)

    batch = 16
    input_size = 32      # small synthetic state-feature vector
    hidden_size = 32     # module default is 256; small for the demo
    output_size = 5

    params = init_dqn_params(k_param, input_size, hidden_size, output_size)
    packed = pack_dqn_params(params)          # pack + bf16-cast once, reused
    x = jax.random.normal(k_x, (batch, input_size), jnp.float32)

    # Full batch in one grid step (single tall tile, dense lane-padded store).
    out = jax.block_until_ready(dqn_forward(x, packed))
    ref = dqn_reference(x, params)
    assert out.shape == (batch, output_size)
    assert jnp.allclose(out, ref, atol=1e-3, rtol=1e-3), "mismatch vs reference"

    # Non-multiple-of-8 batch: one full-dim tile, no host-side pad/copy.
    x_odd = x[:11]
    out_odd = jax.block_until_ready(dqn_forward(x_odd, packed))
    assert out_odd.shape == (11, output_size)
    assert jnp.allclose(out_odd, dqn_reference(x_odd, params),
                        atol=1e-3, rtol=1e-3), "mismatch (odd batch)"

    # Multi-tile grid with a partial last block (40 = 2*16 + 8): exercises the
    # tiled path, still no host-side padding (rows past B are discarded).
    x_big = jax.random.normal(k_big, (40, input_size), jnp.float32)
    out_big = jax.block_until_ready(dqn_forward(x_big, packed, batch_tile=16))
    assert out_big.shape == (40, output_size)
    assert jnp.allclose(out_big, dqn_reference(x_big, params),
                        atol=1e-3, rtol=1e-3), "mismatch (tiled batch)"

    print("KERNEL_OK")
</pallas_src>

<mosaic_0001>
module attributes {stable_mosaic.version = 11 : i64} {
  func.func @_dqn_kernel(%arg0: i32, %arg1: memref<16x32xf32, #tpu.memory_space<vmem>>, %arg2: memref<416x128xbf16, #tpu.memory_space<vmem>>, %arg3: memref<4x128xf32, #tpu.memory_space<vmem>>, %arg4: memref<16x128xf32, #tpu.memory_space<vmem>>) attributes {dimension_semantics = [#tpu.dimension_semantics<parallel>], iteration_bounds = array<i64: 1>, scalar_prefetch = 0 : i64, scratch_operands = 0 : i64, tpu.core_type = #tpu.core_type<tc>, window_params = [{transform_indices = @transform_0, window_bounds = array<i64: 16, 32>}, {pipeline_mode = #tpu.pipeline_mode<synchronous>, transform_indices = @transform_1, window_bounds = array<i64: 416, 128>}, {pipeline_mode = #tpu.pipeline_mode<synchronous>, transform_indices = @transform_2, window_bounds = array<i64: 4, 128>}, {transform_indices = @transform_3, window_bounds = array<i64: 16, 128>}]} {
    %c0 = arith.constant 0 : index
    %c0_0 = arith.constant 0 : index
    %0 = vector.load %arg3[%c0, %c0_0] : memref<4x128xf32, #tpu.memory_space<vmem>>, vector<4x128xf32>
    %c0_1 = arith.constant 0 : index
    %c0_2 = arith.constant 0 : index
    %1 = vector.load %arg1[%c0_1, %c0_2] : memref<16x32xf32, #tpu.memory_space<vmem>>, vector<16x32xf32>
    %2 = arith.truncf %1 : vector<16x32xf32> to vector<16x32xbf16>
    %c0_3 = arith.constant 0 : index
    %c0_4 = arith.constant 0 : index
    %3 = vector.load %arg2[%c0_3, %c0_4] : memref<416x128xbf16, #tpu.memory_space<vmem>>, vector<32x128xbf16>
    %cst = arith.constant dense<0.000000e+00> : vector<16x128xf32>
    %4 = tpu.matmul %2, %3, %cst {dimension_numbers = #tpu.dot_dimension_numbers<[1], [0], [0], [1], [0, 0, 1, 1], [], []>} : vector<16x32xbf16>, vector<32x128xbf16>, vector<16x128xf32> -> vector<16x128xf32>
    %5 = vector.extract_strided_slice %0 {offsets = [0, 0], sizes = [1, 128], strides = [1, 1]} : vector<4x128xf32> to vector<1x128xf32>
    %6 = vector.broadcast %5 : vector<1x128xf32> to vector<16x128xf32>
    %7 = arith.addf %4, %6 : vector<16x128xf32>
    %cst_5 = arith.constant 0.000000e+00 : f32
    %8 = vector.broadcast %cst_5 : f32 to vector<16x128xf32>
    %9 = arith.maximumf %7, %8 : vector<16x128xf32>
    %10 = arith.truncf %9 : vector<16x128xf32> to vector<16x128xbf16>
    %c32 = arith.constant 32 : index
    %c0_6 = arith.constant 0 : index
    %11 = vector.load %arg2[%c32, %c0_6] : memref<416x128xbf16, #tpu.memory_space<vmem>>, vector<128x128xbf16>
    %cst_7 = arith.constant dense<0.000000e+00> : vector<16x128xf32>
    %12 = tpu.matmul %10, %11, %cst_7 {dimension_numbers = #tpu.dot_dimension_numbers<[1], [0], [0], [1], [0, 0, 1, 1], [], []>} : vector<16x128xbf16>, vector<128x128xbf16>, vector<16x128xf32> -> vector<16x128xf32>
    %13 = vector.extract_strided_slice %0 {offsets = [1, 0], sizes = [1, 128], strides = [1, 1]} : vector<4x128xf32> to vector<1x128xf32>
    %14 = vector.broadcast %13 : vector<1x128xf32> to vector<16x128xf32>
    %15 = arith.addf %12, %14 : vector<16x128xf32>
    %cst_8 = arith.constant 0.000000e+00 : f32
    %16 = vector.broadcast %cst_8 : f32 to vector<16x128xf32>
    %17 = arith.maximumf %15, %16 : vector<16x128xf32>
    %18 = arith.truncf %17 : vector<16x128xf32> to vector<16x128xbf16>
    %c160 = arith.constant 160 : index
    %c0_9 = arith.constant 0 : index
    %19 = vector.load %arg2[%c160, %c0_9] : memref<416x128xbf16, #tpu.memory_space<vmem>>, vector<128x128xbf16>
    %cst_10 = arith.constant dense<0.000000e+00> : vector<16x128xf32>
    %20 = tpu.matmul %18, %19, %cst_10 {dimension_numbers = #tpu.dot_dimension_numbers<[1], [0], [0], [1], [0, 0, 1, 1], [], []>} : vector<16x128xbf16>, vector<128x128xbf16>, vector<16x128xf32> -> vector<16x128xf32>
    %21 = vector.extract_strided_slice %0 {offsets = [2, 0], sizes = [1, 128], strides = [1, 1]} : vector<4x128xf32> to vector<1x128xf32>
    %22 = vector.broadcast %21 : vector<1x128xf32> to vector<16x128xf32>
    %23 = arith.addf %20, %22 : vector<16x128xf32>
    %cst_11 = arith.constant 0.000000e+00 : f32
    %24 = vector.broadcast %cst_11 : f32 to vector<16x128xf32>
    %25 = arith.maximumf %23, %24 : vector<16x128xf32>
    %26 = arith.truncf %25 : vector<16x128xf32> to vector<16x128xbf16>
    %c288 = arith.constant 288 : index
    %c0_12 = arith.constant 0 : index
    %27 = vector.load %arg2[%c288, %c0_12] : memref<416x128xbf16, #tpu.memory_space<vmem>>, vector<128x128xbf16>
    %cst_13 = arith.constant dense<0.000000e+00> : vector<16x128xf32>
    %28 = tpu.matmul %26, %27, %cst_13 {dimension_numbers = #tpu.dot_dimension_numbers<[1], [0], [0], [1], [0, 0, 1, 1], [], []>} : vector<16x128xbf16>, vector<128x128xbf16>, vector<16x128xf32> -> vector<16x128xf32>
    %29 = vector.extract_strided_slice %0 {offsets = [3, 0], sizes = [1, 128], strides = [1, 1]} : vector<4x128xf32> to vector<1x128xf32>
    %30 = vector.broadcast %29 : vector<1x128xf32> to vector<16x128xf32>
    %31 = arith.addf %28, %30 : vector<16x128xf32>
    %c0_14 = arith.constant 0 : index
    %c0_15 = arith.constant 0 : index
    %32 = vector.load %arg4[%c0_14, %c0_15] : memref<16x128xf32, #tpu.memory_space<vmem>>, vector<16x128xf32>
    tpu.vector_store %arg4[%c0_14, %c0_15], %31 {strides = array<i32>} : memref<16x128xf32, #tpu.memory_space<vmem>>, vector<16x128xf32>,
    return
  }
  func.func @transform_0(%arg0: i32) -> (i32, i32) {
    %c0_i32 = arith.constant 0 : i32
    %c0_i32_0 = arith.constant 0 : i32
    return %arg0, %c0_i32 : i32, i32
  }
  func.func @transform_1(%arg0: i32) -> (i32, i32) {
    %c0_i32 = arith.constant 0 : i32
    %c0_i32_0 = arith.constant 0 : i32
    %c0_i32_1 = arith.constant 0 : i32
    return %c0_i32, %c0_i32_0 : i32, i32
  }
  func.func @transform_2(%arg0: i32) -> (i32, i32) {
    %c0_i32 = arith.constant 0 : i32
    %c0_i32_0 = arith.constant 0 : i32
    %c0_i32_1 = arith.constant 0 : i32
    return %c0_i32, %c0_i32_0 : i32, i32
  }
  func.func @transform_3(%arg0: i32) -> (i32, i32) {
    %c0_i32 = arith.constant 0 : i32
    %c0_i32_0 = arith.constant 0 : i32
    return %arg0, %c0_i32 : i32, i32
  }
}

</mosaic_0001>

<bundles_post_ra>
// kernel: _dqn_forward_impl.1
= control target key start
LH: loop header
LB: loop body
LE: loop exit
PB: predicated region body
PF: predicated region fallthrough
CT: control target
= control target key end

     0   :  { %8 = vsyncpa [#allocation3], 0  ;;  %s609_s0 = inlined_call_operand.hbm [shape: f32[16,32], index: 0, kind: input, shape index: {}]   ;;  %s610_s1 = inlined_call_operand.hbm [shape: bf16[416,128], index: 1, kind: input, shape index: {}]   ;;  %s611_s2 = inlined_call_operand.hbm [shape: f32[4,128], index: 2, kind: input, shape index: {}]   ;;  %s612_s3 = inlined_call_operand.vmem [shape: f32[16,128], index: 3, kind: output, shape index: {}]  }
   0x1   :  { %9 = vsyncpa [#allocation5], 0  ;;  %s27_s14 = sshll.u32 %s610_s1, 4  ;;  %s567_s15 = smov [#allocation4]   ;;  %s28_s14 = int_to_ptr.hbm [resolvable:$true] %s27_s14 }
   0x2   :  { %s29_s16 = sshll.u32 %s567_s15, 4  ;;  %s14_s19 = sshll.u32 %s609_s0, 4  ;;  %s30_s16 = int_to_ptr.vmem [resolvable:$true] %s29_s16  ;;  %s15_s19 = int_to_ptr.hbm [resolvable:$true] %s14_s19 }
   0x3   :  { %s568_s20 = smov 64   ;;  %s569_s21 = smov 4  }
   0x4   :  { %35 = dma.hbm_to_vmem [thread:$0]  %s28_s14, 3328, %s30_s16, [#allocation5], %s568_s20, %s568_s20, %s569_s21  }
   0x5   :  { %s570_s22 = smov [#allocation2]   ;;  %s571_s24 = smov 128  }
   0x6   :  { %s16_s23 = sshll.u32 %s570_s22, 4  ;;  %s572_s25 = smov 8   ;;  %s17_s23 = int_to_ptr.vmem [resolvable:$true] %s16_s23 }
   0x7   :  { %22 = dma.hbm_to_vmem [thread:$0]  %s15_s19, 256, %s17_s23, [#allocation3], %s571_s24, %s571_s24, %s572_s25  }
   0x8   :  { %s41_s27 = sshll.u32 %s611_s2, 4  ;;  %s573_s28 = smov [#allocation6]   ;;  %s42_s27 = int_to_ptr.hbm [resolvable:$true] %s41_s27 }
   0x9   :  { %s43_s29 = sshll.u32 %s573_s28, 4  ;;  %s44_s29 = int_to_ptr.vmem [resolvable:$true] %s43_s29 }
   0xa   :  { %46 = dma.hbm_to_vmem [thread:$0]  %s42_s27, 64, %s44_s29, [#allocation5]  }
   0xb   :  { %563 = dma.done.wait [#allocation3], 256  }
   0xc   :  { %564 = vsyncadd [#allocation3], 4294967040 }
   0xd   :  { %565 = dma.done.wait [#allocation5], 3392  }
   0xe   :  { %566 = vsyncadd [#allocation5], 4294963904  ;;  %v459_v0 = vld [vmem:[#allocation4 + $0x8] sm:$0xff]  ;;  %v458_v2 = vld [vmem:[#allocation4] sm:$0xff]  ;;  %vm81_vm0 = vcmask 261120  }
   0xf   :  { %v467_v1 = vld [vmem:[#allocation4 + $0x48] sm:$0xff]  ;;  %91 = vmatpush.bf16.msra.mxu0 %v459_v0  ;;  %v61_v3 = vld [vmem:[#allocation2] sm:$0xff]  ;;  %v62_v4 = vld [vmem:[#allocation2 + $0x8] sm:$0xff] }
  0x10   :  { %167 = vmatpush.bf16.msra.mxu1 %v467_v1  ;;  %v466_v5 = vld [vmem:[#allocation4 + $0x40] sm:$0xff]  ;;  %v63_v6 = vpack.c.bf16 %v62_v4, %v61_v3  ;;  %v465_v7 = vld [vmem:[#allocation4 + $0x38] sm:$0xff]  ;;  %v464_v8 = vld [vmem:[#allocation4 + $0x30] sm:$0xff] }
  0x11   :  { %v463_v9 = vld [vmem:[#allocation4 + $0x28] sm:$0xff]  ;;  %v462_v10 = vld [vmem:[#allocation4 + $0x20] sm:$0xff]  ;;  %v461_v11 = vld [vmem:[#allocation4 + $0x18] sm:$0xff] }
  0x12   :  { %v460_v12 = vld [vmem:[#allocation4 + $0x10] sm:$0xff]  ;;  %v475_v13 = vld [vmem:[#allocation4 + $0x88] sm:$0xff]  ;;  %v474_v14 = vld [vmem:[#allocation4 + $0x80] sm:$0xff] }
  0x13   :  { %92 = vmatpush.bf16.msra.mxu0 %v458_v2  ;;  %249 = vmatpush.bf16.msra.mxu2 %v475_v13  ;;  %v473_v15 = vld [vmem:[#allocation4 + $0x78] sm:$0xff]  ;;  %v472_v16 = vld [vmem:[#allocation4 + $0x70] sm:$0xff]  ;;  %v471_v26 = vld [vmem:[#allocation4 + $0x68] sm:$0xff] }
  0x14   :  { %168 = vmatpush.bf16.msra.mxu1 %v466_v5  ;;  %v60_v17 = vld [vmem:[#allocation6] sm:$0xf]  ;;  %v470_v27 = vld [vmem:[#allocation4 + $0x60] sm:$0xff]  ;;  %v469_v28 = vld [vmem:[#allocation4 + $0x58] sm:$0xff] }
  0x15   :  { %v68_v19 = vperm.slane %v60_v17, 0  ;;  %v468_v29 = vld [vmem:[#allocation4 + $0x50] sm:$0xff]  ;;  %v483_v30 = vld [vmem:[#allocation4 + $0xc8] sm:$0xff]  ;;  %v482_v31 = vld [vmem:[#allocation4 + $0xc0] sm:$0xff]  ;;  %v118_v35 = vperm.slane %v60_v17, 1  ;;  %v200_v47 = vperm.slane %v60_v17, 2 }
  0x16   :  { %361 = vmatmul.msk.bf16.vlgmr.msra.gmra.mxu0 %vm81_vm0, %v63_v6  ;;  %331 = vmatpush.bf16.msra.mxu3 %v483_v30  ;;  %v481_v32 = vld [vmem:[#allocation4 + $0xb8] sm:$0xff]  ;;  %v480_v33 = vld [vmem:[#allocation4 + $0xb0] sm:$0xff]  ;;  %v479_v42 = vld [vmem:[#allocation4 + $0xa8] sm:$0xff]  ;;  %v282_v54 = vperm.slane %v60_v17, 3 }
  0x17   :  { %250 = vmatpush.bf16.msra.mxu2 %v474_v14  ;;  %v478_v43 = vld [vmem:[#allocation4 + $0xa0] sm:$0xff]  ;;  %v477_v44 = vld [vmem:[#allocation4 + $0x98] sm:$0xff]  ;;  %v476_v45 = vld [vmem:[#allocation4 + $0x90] sm:$0xff] }
  0x18   :  { %169 = vmatpush.bf16.msra.mxu1 %v465_v7 }
  0x1a   :  { %332 = vmatpush.bf16.msra.mxu3 %v482_v31 }
  0x1b   :  { %251 = vmatpush.bf16.msra.mxu2 %v473_v15 }
  0x1c   :  { %170 = vmatpush.bf16.msra.mxu1 %v464_v8 }
  0x1e   :  { %333 = vmatpush.bf16.msra.mxu3 %v481_v32 }
  0x1f   :  { %252 = vmatpush.bf16.msra.mxu2 %v472_v16 }
  0x20   :  { %171 = vmatpush.bf16.msra.mxu1 %v463_v9 }
  0x22   :  { %334 = vmatpush.bf16.msra.mxu3 %v480_v33 }
  0x23   :  { %253 = vmatpush.bf16.msra.mxu2 %v471_v26 }
  0x24   :  { %172 = vmatpush.bf16.msra.mxu1 %v462_v10 }
  0x26   :  { %335 = vmatpush.bf16.msra.mxu3 %v479_v42 }
  0x27   :  { %254 = vmatpush.bf16.msra.mxu2 %v470_v27 }
  0x28   :  { %173 = vmatpush.bf16.msra.mxu1 %v461_v11 }
  0x2a   :  { %336 = vmatpush.bf16.msra.mxu3 %v478_v43 }
  0x2b   :  { %255 = vmatpush.bf16.msra.mxu2 %v469_v28 }
  0x2c   :  { %174 = vmatpush.bf16.msra.mxu1 %v460_v12 }
  0x2e   :  { %337 = vmatpush.bf16.msra.mxu3 %v477_v44 }
  0x2f   :  { %256 = vmatpush.bf16.msra.mxu2 %v468_v29 }
  0x32   :  { %338 = vmatpush.bf16.msra.mxu3 %v476_v45 }
  0x93   :  { %v94_v18 = vpop.f32.mrf.mxu0 }
  0x94   :  { %v95_v20 = vadd.f32 %v94_v18, %v68_v19 }
  0x96   :  { %v99_v23 = vmax.f32 %v95_v20, 0.0 }
  0x9b   :  { %v96_v21 = vpop.f32.mrf.mxu0 }
  0x9c   :  { %v97_v22 = vadd.f32 %v96_v21, %v68_v19 }
  0x9e   :  { %v100_v24 = vmax.f32 %v97_v22, 0.0 }
  0xa0   :  { %v101_v25 = vpack.c.bf16 %v100_v24, %v99_v23 }
  0xa2   :  { %175 = vmatmul.bf16.vlgmr.msra.gmra.mxu1 %v101_v25 }
 0x11f   :  { %v176_v34 = vpop.f32.mrf.mxu1 }
 0x120   :  { %v177_v36 = vadd.f32 %v176_v34, %v118_v35 }
 0x122   :  { %v181_v39 = vmax.f32 %v177_v36, 0.0 }
 0x127   :  { %v178_v37 = vpop.f32.mrf.mxu1 }
 0x128   :  { %v179_v38 = vadd.f32 %v178_v37, %v118_v35 }
 0x12a   :  { %v182_v40 = vmax.f32 %v179_v38, 0.0 }
 0x12c   :  { %v183_v41 = vpack.c.bf16 %v182_v40, %v181_v39 }
 0x12e   :  { %257 = vmatmul.bf16.vlgmr.msra.gmra.mxu2 %v183_v41 }
 0x1b1   :  { %v258_v46 = vpop.f32.mrf.mxu2 }
 0x1b2   :  { %v259_v48 = vadd.f32 %v258_v46, %v200_v47 }
 0x1b4   :  { %v263_v51 = vmax.f32 %v259_v48, 0.0 }
 0x1b9   :  { %v260_v49 = vpop.f32.mrf.mxu2 }
 0x1ba   :  { %v261_v50 = vadd.f32 %v260_v49, %v200_v47 }
 0x1bc   :  { %v264_v52 = vmax.f32 %v261_v50, 0.0 }
 0x1be   :  { %v265_v53 = vpack.c.bf16 %v264_v52, %v263_v51 }
 0x1c0   :  { %339 = vmatmul.bf16.vlgmr.msra.gmra.mxu3 %v265_v53 }
 0x243   :  { %v340_v55 = vpop.f32.mrf.mxu3 }
 0x244   :  { %v341_v56 = vadd.f32 %v340_v55, %v282_v54 }
 0x246   :  { %345 = vst [vmem:[%s612_s3] sm:$0xff] %v341_v56 }
 0x24b   :  { %v342_v57 = vpop.f32.mrf.mxu3 }
 0x24c   :  { %v343_v58 = vadd.f32 %v342_v57, %v282_v54 }
 0x24e   :  { %346 = vst [vmem:[%s612_s3 + $0x8] sm:$0xff] %v343_v58 }
 0x24f   :  { %351 = vsyncpa [#allocation3], 1 }
 0x250   :  { %352 = vsyncpa [#allocation5], 1 }

</bundles_post_ra>
